<compile_context>
chip_gen: v5e
topology: v5e:2x2
jax: 0.10.0
libtpu: 0.0.40
codegen_flags: <defaults>
</compile_context>

<pallas_src>
import math

import jax
import jax.numpy as jnp
from jax import lax
from jax.experimental import pallas as pl
from jax.experimental.pallas import tpu as pltpu


def _round_up(x, m):
    return (x + m - 1) // m * m


# -----------------------------------------------------------------------------
# PyTorch-layout parameter construction (nn.GRUCell / nn.Linear conventions)
# -----------------------------------------------------------------------------
def init_params(key, img_feat_dim, state_dim, sensory_dim, union1_dim,
                union2_dim):
    def uni(k, shape, bound):
        return jax.random.uniform(k, shape, jnp.float32, -bound, bound)

    def gru(k, in_dim, hid):
        b = 1.0 / math.sqrt(hid)
        k0, k1, k2, k3 = jax.random.split(k, 4)
        return dict(weight_ih=uni(k0, (3 * hid, in_dim), b),
                    weight_hh=uni(k1, (3 * hid, hid), b),
                    bias_ih=uni(k2, (3 * hid,), b),
                    bias_hh=uni(k3, (3 * hid,), b))

    def lin(k, in_dim, out_dim):
        b = 1.0 / math.sqrt(in_dim)
        k0, k1 = jax.random.split(k)
        return dict(weight=uni(k0, (out_dim, in_dim), b),
                    bias=uni(k1, (out_dim,), b))

    keys = jax.random.split(key, 8)
    return dict(
        img_feat_gru=gru(keys[0], img_feat_dim, sensory_dim),
        state_gru=gru(keys[1], state_dim, sensory_dim),
        union1_gru=gru(keys[2], sensory_dim * 2, union1_dim),
        union2_gru=gru(keys[3], union1_dim, union2_dim),
        img_feat_out=lin(keys[4], sensory_dim, img_feat_dim),
        state_out=lin(keys[5], sensory_dim, state_dim),
        union1_out=lin(keys[6], union1_dim, sensory_dim * 2),
        union2_out=lin(keys[7], union2_dim, union1_dim),
    )


# -----------------------------------------------------------------------------
# Host-side packing into two kernel slabs
# -----------------------------------------------------------------------------
def pack_params(tp, compute_dtype=jnp.bfloat16):
    """Repack PyTorch-layout HRNNCell params into one weight slab + one bias slab.

    Weight slab segments (rows padded to x8, lanes to x128):
      w_x     (IMG+STA, 6S)       fused img|state GRU input weights (block diag)
      w_hsens (2S,      6S)       fused img|state GRU hidden weights (block diag)
      w_mix1  (2S, 3U1+IMG+STA)   union1 W_ih ++ [img_feat_out | state_out]
      w_hu1   (U1, 3U1)           union1 W_hh
      w_mix2  (U1, 3U2+2S)        union2 W_ih ++ union1_out
      w_hu2   (U2, 3U2)           union2 W_hh
      w_u2o   (U2, U1)            union2_out

    Fused sensory GRU column layout: [r_img r_st | z_img z_st | n_img n_st].
    r/z biases are pre-folded (b_i*+b_h*); the n gate keeps b_in (input side)
    and b_hn (hidden side, multiplied by r) separate (PyTorch GRUCell math).
    """
    S = tp['img_feat_gru']['weight_hh'].shape[1]
    U1 = tp['union1_gru']['weight_hh'].shape[1]
    U2 = tp['union2_gru']['weight_hh'].shape[1]
    IMG = tp['img_feat_out']['weight'].shape[0]
    STA = tp['state_out']['weight'].shape[0]
    OUT = IMG + STA

    def gates_t(w, H):   # [3H, in] -> (r, z, n), each [in, H]
        return w[:H].T, w[H:2 * H].T, w[2 * H:].T

    def bgates(b, H):
        return b[:H], b[H:2 * H], b[2 * H:]

    # ---- fused img+state ("sensory") GRU, block-diagonal, gate-major --------
    g_if, g_st = tp['img_feat_gru'], tp['state_gru']
    wx = jnp.zeros((IMG + STA, 6 * S), jnp.float32)
    wh_sens = jnp.zeros((2 * S, 6 * S), jnp.float32)
    xi = gates_t(g_if['weight_ih'], S)
    xs = gates_t(g_st['weight_ih'], S)
    hi = gates_t(g_if['weight_hh'], S)
    hs = gates_t(g_st['weight_hh'], S)
    for g in range(3):
        c0 = 2 * S * g
        wx = wx.at[:IMG, c0:c0 + S].set(xi[g])
        wx = wx.at[IMG:, c0 + S:c0 + 2 * S].set(xs[g])
        wh_sens = wh_sens.at[:S, c0:c0 + S].set(hi[g])
        wh_sens = wh_sens.at[S:, c0 + S:c0 + 2 * S].set(hs[g])

    bii = bgates(g_if['bias_ih'], S)
    bhi = bgates(g_if['bias_hh'], S)
    bis = bgates(g_st['bias_ih'], S)
    bhs = bgates(g_st['bias_hh'], S)
    bi_sens = jnp.concatenate([bii[0] + bhi[0], bis[0] + bhs[0],
                               bii[1] + bhi[1], bis[1] + bhs[1],
                               bii[2], bis[2]])
    bhn_sens = jnp.concatenate([bhi[2], bhs[2]])

    # ---- union1 GRU input  ++  (img_feat_out | state_out) decode ------------
    g_u1 = tp['union1_gru']
    w_mix1 = jnp.zeros((2 * S, 3 * U1 + OUT), jnp.float32)
    w_mix1 = w_mix1.at[:, :3 * U1].set(g_u1['weight_ih'].T)
    w_mix1 = w_mix1.at[:S, 3 * U1:3 * U1 + IMG].set(tp['img_feat_out']['weight'].T)
    w_mix1 = w_mix1.at[S:, 3 * U1 + IMG:].set(tp['state_out']['weight'].T)
    w_hu1 = g_u1['weight_hh'].T
    bi1 = bgates(g_u1['bias_ih'], U1)
    bh1 = bgates(g_u1['bias_hh'], U1)
    bi_u1 = jnp.concatenate([bi1[0] + bh1[0], bi1[1] + bh1[1], bi1[2]])
    bhn_u1 = bh1[2]
    b_dec = jnp.concatenate([tp['img_feat_out']['bias'], tp['state_out']['bias']])

    # ---- union2 GRU input  ++  union1_out (next sensory hidden) -------------
    g_u2 = tp['union2_gru']
    w_mix2 = jnp.concatenate([g_u2['weight_ih'].T,
                              tp['union1_out']['weight'].T], axis=1)
    w_hu2 = g_u2['weight_hh'].T
    bi2 = bgates(g_u2['bias_ih'], U2)
    bh2 = bgates(g_u2['bias_hh'], U2)
    bi_u2 = jnp.concatenate([bi2[0] + bh2[0], bi2[1] + bh2[1], bi2[2]])
    bhn_u2 = bh2[2]
    b_u1o = tp['union1_out']['bias']
    w_u2o = tp['union2_out']['weight'].T
    b_u2o = tp['union2_out']['bias']

    # ---- single weight slab --------------------------------------------------
    weights = [wx, wh_sens, w_mix1, w_hu1, w_mix2, w_hu2, w_u2o]
    w_width = _round_up(max(int(w.shape[1]) for w in weights), 128)
    offs, r0 = [], 0
    for w in weights:
        offs.append(r0)
        r0 += _round_up(int(w.shape[0]), 8)
    w_slab = jnp.zeros((r0, w_width), jnp.float32)
    for w, o in zip(weights, offs):
        w_slab = w_slab.at[o:o + w.shape[0], :w.shape[1]].set(w)
    w_slab = w_slab.astype(compute_dtype)   # bf16 operands: ~3x fewer MXU passes

    # ---- single bias slab (kept f32; added to f32 accumulators) -------------
    biases = [bi_sens, bhn_sens, bi_u1, bhn_u1, b_dec, bi_u2, bhn_u2, b_u1o, b_u2o]
    b_width = _round_up(max(int(b.shape[0]) for b in biases), 128)
    b_slab = jnp.zeros((len(biases), b_width), jnp.float32)
    for i, b in enumerate(biases):
        b_slab = b_slab.at[i, :b.shape[0]].set(b)

    meta = dict(S=S, U1=U1, U2=U2, IMG=IMG, STA=STA,
                w_offsets=tuple(offs),
                w_shapes=tuple((int(w.shape[0]), int(w.shape[1])) for w in weights),
                b_widths=tuple(int(b.shape[0]) for b in biases))
    return dict(w_slab=w_slab, b_slab=b_slab, meta=meta)


# -----------------------------------------------------------------------------
# Kernel
# -----------------------------------------------------------------------------
def _build_kernel(meta, time_chunk, t_total, compute_dtype):
    S, U1, U2 = meta['S'], meta['U1'], meta['U2']
    IMG, STA = meta['IMG'], meta['STA']
    w_offs, w_shapes = meta['w_offsets'], meta['w_shapes']
    b_widths = meta['b_widths']

    def kernel(x_ref, h0_ref, w_ref, b_ref, dec_ref, hfin_ref):
        c = pl.program_id(0)

        # Chunk 0: seed the resident hidden-carry output block (accumulator
        # pattern; constant index_map keeps it VMEM-resident across chunks).
        @pl.when(c == 0)
        def _():
            hfin_ref[...] = h0_ref[...]

        # ---- hoisted once per chunk: static slab slices ----------------------
        def wseg(i):
            o, (rows, cols) = w_offs[i], w_shapes[i]
            return w_ref[o:o + rows, 0:cols]

        segs = [wseg(i) for i in range(7)]
        w_x, w_hsens, w_mix1, w_hu1, w_mix2, w_hu2, w_u2o = segs

        def bseg(i):
            return b_ref[i:i + 1, 0:b_widths[i]]

        bsegs = [bseg(i) for i in range(9)]
        (bi_sens, bhn_sens, bi_u1, bhn_u1, b_dec,
         bi_u2, bhn_u2, b_u1o, b_u2o) = bsegs

        def mm(a, w):
            # bf16 (or f32) MXU operands, f32 accumulation.
            return jnp.dot(a.astype(compute_dtype), w,
                           preferred_element_type=jnp.float32)

        def gru_tail(gi, gh, bhn, h, H):
            # PyTorch GRUCell; r/z biases folded into gi, n keeps b_in/b_hn split.
            r = jax.nn.sigmoid(gi[:, :H] + gh[:, :H])
            z = jax.nn.sigmoid(gi[:, H:2 * H] + gh[:, H:2 * H])
            n = jnp.tanh(gi[:, 2 * H:] + r * (gh[:, 2 * H:] + bhn))
            return (1.0 - z) * n + z * h

        h_packed = hfin_ref[...]
        carry0 = (h_packed[:, :2 * S],              # [img_feat | state] hidden
                  h_packed[:, 2 * S:2 * S + U1],    # union1 hidden
                  h_packed[:, 2 * S + U1:])         # union2 hidden

        def step(i, carry):
            h_sens, h_u1, h_u2 = carry
            x_t = x_ref[i]                                     # (B, IMG+STA)

            # img_feat + state GRUs fused into one 2S-wide GRU (block-diag W).
            gi = mm(x_t, w_x) + bi_sens
            gh = mm(h_sens, w_hsens)
            sens = gru_tail(gi, gh, bhn_sens, h_sens, 2 * S)   # [img_hid|state_hid]

            # union1 gate input  ++  (img_feat_out | state_out) decode: one dot.
            mix1 = mm(sens, w_mix1)
            gi_u1 = mix1[:, :3 * U1] + bi_u1
            dec_ref[i] = (mix1[:, 3 * U1:] + b_dec).astype(dec_ref.dtype)

            gh_u1 = mm(h_u1, w_hu1)
            u1_hid = gru_tail(gi_u1, gh_u1, bhn_u1, h_u1, U1)

            # union2 gate input  ++  union1_out (next sensory hidden): one dot.
            mix2 = mm(u1_hid, w_mix2)
            gi_u2 = mix2[:, :3 * U2] + bi_u2
            new_h_sens = mix2[:, 3 * U2:] + b_u1o

            gh_u2 = mm(h_u2, w_hu2)
            u2_hid = gru_tail(gi_u2, gh_u2, bhn_u2, h_u2, U2)

            new_h_u1 = mm(u2_hid, w_u2o) + b_u2o
            return (new_h_sens, new_h_u1, u2_hid)

        if t_total % time_chunk == 0:
            if time_chunk <= 4:
                # Tiny static chunk (e.g. single-step API): unroll at trace time.
                carry = carry0
                for i in range(time_chunk):
                    carry = step(i, carry)
            else:
                carry = lax.fori_loop(0, time_chunk, step, carry0)
        else:
            # Last chunk may be partial: dynamic trip count; pad rows of the
            # streamed dec block are never written and are sliced off on host.
            n_valid = jnp.minimum(time_chunk, t_total - c * time_chunk)
            carry = lax.fori_loop(0, n_valid, step, carry0)

        h_sens, h_u1, h_u2 = carry
        hfin_ref[:, :2 * S] = h_sens
        hfin_ref[:, 2 * S:2 * S + U1] = h_u1
        hfin_ref[:, 2 * S + U1:] = h_u2

    return kernel


# -----------------------------------------------------------------------------
# Wrapper: time-chunked fused scan (one pallas_call, weights resident)
# -----------------------------------------------------------------------------
def _pack_hidden(hid_dict, B, S, U1, U2):
    hid_dict = hid_dict or {}

    def get(name, d):
        v = hid_dict.get(name)
        return jnp.zeros((B, d), jnp.float32) if v is None else v.astype(jnp.float32)

    return jnp.concatenate([get('img_feat', S), get('state', S),
                            get('union1', U1), get('union2', U2)], axis=-1)


def hrnn_scan(packed, z_img_seq, x_state_seq, hid_dict=None, time_chunk=128):
    """Run T HRNNCell steps inside one pallas_call.

    z_img_seq: [T, B, img_feat_dim], x_state_seq: [T, B, state_dim].
    Returns (z_img_dec_seq, y_state_seq, final hid_dict).
    """
    meta = packed['meta']
    S, U1, U2 = meta['S'], meta['U1'], meta['U2']
    IMG, STA = meta['IMG'], meta['STA']
    T, B, img_dim = z_img_seq.shape
    assert img_dim == IMG and x_state_seq.shape == (T, B, STA)
    XDIM, OUT, HID = IMG + STA, IMG + STA, 2 * S + U1 + U2

    tc = max(1, min(time_chunk, T))
    n_chunks = -(-T // tc)
    t_pad = n_chunks * tc

    # Pack the two streamed inputs into one lane-denser (T, B, IMG+STA) array.
    x = jnp.concatenate([z_img_seq.astype(jnp.float32),
                         x_state_seq.astype(jnp.float32)], axis=-1)
    if t_pad != T:
        x = jnp.pad(x, ((0, t_pad - T), (0, 0), (0, 0)))

    h0 = _pack_hidden(hid_dict, B, S, U1, U2)
    kernel = _build_kernel(meta, tc, T, packed['w_slab'].dtype)

    dec, h_fin = pl.pallas_call(
        kernel,
        out_shape=(jax.ShapeDtypeStruct((t_pad, B, OUT), jnp.float32),
                   jax.ShapeDtypeStruct((B, HID), jnp.float32)),
        grid_spec=pltpu.PrefetchScalarGridSpec(
            num_scalar_prefetch=0,
            grid=(n_chunks,),
            in_specs=[
                pl.BlockSpec((tc, B, XDIM), lambda c: (c, 0, 0)),   # streamed x
                pl.BlockSpec((B, HID), lambda c: (0, 0)),           # h0 (resident)
                pl.BlockSpec(packed['w_slab'].shape, lambda c: (0, 0)),
                pl.BlockSpec(packed['b_slab'].shape, lambda c: (0, 0)),
            ],
            out_specs=[
                pl.BlockSpec((tc, B, OUT), lambda c: (c, 0, 0)),    # streamed dec
                pl.BlockSpec((B, HID), lambda c: (0, 0)),           # hidden carry
            ],
        ),
        compiler_params=pltpu.CompilerParams(
            dimension_semantics=("arbitrary",)),   # sequential recurrence
    )(x, h0, packed['w_slab'], packed['b_slab'])

    dec = dec[:T]
    hid = {'img_feat': h_fin[:, :S], 'state': h_fin[:, S:2 * S],
           'union1': h_fin[:, 2 * S:2 * S + U1], 'union2': h_fin[:, 2 * S + U1:]}
    return dec[..., :IMG], dec[..., IMG:], hid


def hrnn_cell(packed, z_img_enc, x_state, hid_dict=None):
    """Single-step forward matching HRNNCell.forward semantics."""
    z, y, hid = hrnn_scan(packed, z_img_enc[None], x_state[None], hid_dict,
                          time_chunk=1)
    return z[0], y[0], hid


# -----------------------------------------------------------------------------
# Pure-JAX reference on the PyTorch-layout parameters
# -----------------------------------------------------------------------------
def _gru_ref(x, h, p):
    hp = jax.lax.Precision.HIGHEST
    H = p['weight_hh'].shape[1]
    gi = jnp.dot(x, p['weight_ih'].T, precision=hp) + p['bias_ih']
    gh = jnp.dot(h, p['weight_hh'].T, precision=hp) + p['bias_hh']
    r = jax.nn.sigmoid(gi[:, :H] + gh[:, :H])
    z = jax.nn.sigmoid(gi[:, H:2 * H] + gh[:, H:2 * H])
    n = jnp.tanh(gi[:, 2 * H:] + r * gh[:, 2 * H:])
    return (1.0 - z) * n + z * h


def _lin_ref(x, p):
    return jnp.dot(x, p['weight'].T,
                   precision=jax.lax.Precision.HIGHEST) + p['bias']


def hrnn_ref_step(tp, z_img, x_state, hid, S):
    img_feat_hid = _gru_ref(z_img, hid['img_feat'], tp['img_feat_gru'])
    state_hid = _gru_ref(x_state, hid['state'], tp['state_gru'])
    sensory = jnp.concatenate([img_feat_hid, state_hid], axis=1)
    union1_hid = _gru_ref(sensory, hid['union1'], tp['union1_gru'])
    union2_hid = _gru_ref(union1_hid, hid['union2'], tp['union2_gru'])
    z_dec = _lin_ref(img_feat_hid, tp['img_feat_out'])
    y_state = _lin_ref(state_hid, tp['state_out'])
    prev_sens = _lin_ref(union1_hid, tp['union1_out'])
    prev_u1 = _lin_ref(union2_hid, tp['union2_out'])
    new_hid = {'img_feat': prev_sens[:, :S], 'state': prev_sens[:, S:],
               'union1': prev_u1, 'union2': union2_hid}
    return z_dec, y_state, new_hid


def hrnn_ref_scan(tp, z_seq, x_seq, hid_dict, S, U1, U2):
    B = z_seq.shape[1]
    hid_dict = hid_dict or {}

    def init(name, d):
        v = hid_dict.get(name)
        return jnp.zeros((B, d), jnp.float32) if v is None else v

    hid = {'img_feat': init('img_feat', S), 'state': init('state', S),
           'union1': init('union1', U1), 'union2': init('union2', U2)}

    def body(h, xt):
        z_t, x_t = xt
        zd, ys, h = hrnn_ref_step(tp, z_t, x_t, h, S)
        return h, (zd, ys)

    hid, (z_outs, y_outs) = lax.scan(body, hid, (z_seq, x_seq))
    return z_outs, y_outs, hid


def _check(name, got, want, tol):
    err = float(jnp.max(jnp.abs(got - want)))
    assert err <= tol, f"{name}: max abs err {err:.3e} > {tol:.1e}"


# -----------------------------------------------------------------------------
# Main
# -----------------------------------------------------------------------------
if __name__ == "__main__":
    B = 2
    img_feat_dim, state_dim = 16, 8
    sensory_dim, union1_dim, union2_dim = 32, 32, 16
    T, TC = 96, 32

    key = jax.random.PRNGKey(0)
    k_params, k_img, k_state = jax.random.split(key, 3)
    torch_params = init_params(k_params, img_feat_dim, state_dim,
                               sensory_dim, union1_dim, union2_dim)

    z_img_seq = jax.random.normal(k_img, (T, B, img_feat_dim), jnp.float32)
    x_state_seq = jax.random.normal(k_state, (T, B, state_dim), jnp.float32)
    hid0 = {'img_feat': None, 'state': None, 'union1': None, 'union2': None}

    rz, ry, rhid = hrnn_ref_scan(torch_params, z_img_seq, x_state_seq, hid0,
                                 sensory_dim, union1_dim, union2_dim)
    hid_keys = ('img_feat', 'state', 'union1', 'union2')

    # 1) f32 MXU operands: tight check of the packing / gate fusions.
    packed_f32 = pack_params(torch_params, compute_dtype=jnp.float32)
    z, y, hid = hrnn_scan(packed_f32, z_img_seq, x_state_seq, hid0, time_chunk=TC)
    jax.block_until_ready((z, y, hid))
    _check("z_img_dec[f32]", z, rz, 2e-3)
    _check("y_state[f32]", y, ry, 2e-3)
    for k in hid_keys:
        _check(f"hid[{k}][f32]", hid[k], rhid[k], 2e-3)

    # 2) bf16 MXU operands (perf path; f32 accumulation, f32 elementwise).
    packed_bf16 = pack_params(torch_params, compute_dtype=jnp.bfloat16)
    zb, yb, hidb = hrnn_scan(packed_bf16, z_img_seq, x_state_seq, hid0,
                             time_chunk=TC)
    jax.block_until_ready((zb, yb, hidb))
    _check("z_img_dec[bf16]", zb, rz, 0.15)
    _check("y_state[bf16]", yb, ry, 0.15)
    for k in hid_keys:
        _check(f"hid[{k}][bf16]", hidb[k], rhid[k], 0.15)

    # 3) Partial final chunk (T not a multiple of the time chunk).
    Tp = 50
    rzp, ryp, rhidp = hrnn_ref_scan(torch_params, z_img_seq[:Tp],
                                    x_state_seq[:Tp], hid0,
                                    sensory_dim, union1_dim, union2_dim)
    zp, yp, hidp = hrnn_scan(packed_f32, z_img_seq[:Tp], x_state_seq[:Tp], hid0,
                             time_chunk=TC)
    jax.block_until_ready((zp, yp, hidp))
    _check("z_img_dec[partial]", zp, rzp, 2e-3)
    _check("y_state[partial]", yp, ryp, 2e-3)
    for k in hid_keys:
        _check(f"hid[{k}][partial]", hidp[k], rhidp[k], 2e-3)

    # 4) Single-step API (matches HRNNCell.forward exactly).
    z1, y1, hid1 = hrnn_cell(packed_f32, z_img_seq[0], x_state_seq[0], hid0)
    jax.block_until_ready((z1, y1, hid1))
    rz1, ry1, rhid1 = hrnn_ref_scan(torch_params, z_img_seq[:1],
                                    x_state_seq[:1], hid0,
                                    sensory_dim, union1_dim, union2_dim)
    _check("z_img_dec[step]", z1, rz1[0], 2e-3)
    _check("y_state[step]", y1, ry1[0], 2e-3)
    for k in hid_keys:
        _check(f"hid[{k}][step]", hid1[k], rhid1[k], 2e-3)

    print("KERNEL_OK")
</pallas_src>

<mosaic_0001>
module attributes {stable_mosaic.version = 11 : i64} {
  func.func @kernel(%arg0: i32, %arg1: memref<32x2x24xf32, #tpu.memory_space<vmem>>, %arg2: memref<2x112xf32, #tpu.memory_space<vmem>>, %arg3: memref<248x256xf32, #tpu.memory_space<vmem>>, %arg4: memref<9x256xf32, #tpu.memory_space<vmem>>, %arg5: memref<32x2x24xf32, #tpu.memory_space<vmem>>, %arg6: memref<2x112xf32, #tpu.memory_space<vmem>>) attributes {dimension_semantics = [#tpu.dimension_semantics<arbitrary>], iteration_bounds = array<i64: 3>, scalar_prefetch = 0 : i64, scratch_operands = 0 : i64, tpu.core_type = #tpu.core_type<tc>, window_params = [{transform_indices = @transform_0, window_bounds = array<i64: 32, 2, 24>}, {pipeline_mode = #tpu.pipeline_mode<synchronous>, transform_indices = @transform_1, window_bounds = array<i64: 2, 112>}, {pipeline_mode = #tpu.pipeline_mode<synchronous>, transform_indices = @transform_2, window_bounds = array<i64: 248, 256>}, {pipeline_mode = #tpu.pipeline_mode<synchronous>, transform_indices = @transform_3, window_bounds = array<i64: 9, 256>}, {transform_indices = @transform_4, window_bounds = array<i64: 32, 2, 24>}, {pipeline_mode = #tpu.pipeline_mode<synchronous>, transform_indices = @transform_5, window_bounds = array<i64: 2, 112>}]} {
    %c0_i32 = arith.constant 0 : i32
    %0 = arith.cmpi eq, %arg0, %c0_i32 : i32
    %1 = arith.extui %0 : i1 to i32
    %c0_i32_0 = arith.constant 0 : i32
    %2 = arith.cmpi ne, %1, %c0_i32_0 : i32
    scf.if %2 {
      %c0_26 = arith.constant 0 : index
      %c0_27 = arith.constant 0 : index
      %28 = vector.load %arg2[%c0_26, %c0_27] : memref<2x112xf32, #tpu.memory_space<vmem>>, vector<2x112xf32>
      %c0_28 = arith.constant 0 : index
      %c0_29 = arith.constant 0 : index
      %29 = vector.load %arg6[%c0_28, %c0_29] : memref<2x112xf32, #tpu.memory_space<vmem>>, vector<2x112xf32>
      tpu.vector_store %arg6[%c0_28, %c0_29], %28 {strides = array<i32>} : memref<2x112xf32, #tpu.memory_space<vmem>>, vector<2x112xf32>,
    } else {
    }
    %c0 = arith.constant 0 : index
    %c0_1 = arith.constant 0 : index
    %3 = vector.load %arg3[%c0, %c0_1] : memref<248x256xf32, #tpu.memory_space<vmem>>, vector<24x192xf32>
    %c24 = arith.constant 24 : index
    %c0_2 = arith.constant 0 : index
    %4 = vector.load %arg3[%c24, %c0_2] : memref<248x256xf32, #tpu.memory_space<vmem>>, vector<64x192xf32>
    %c88 = arith.constant 88 : index
    %c0_3 = arith.constant 0 : index
    %5 = vector.load %arg3[%c88, %c0_3] : memref<248x256xf32, #tpu.memory_space<vmem>>, vector<64x120xf32>
    %c152 = arith.constant 152 : index
    %c0_4 = arith.constant 0 : index
    %6 = vector.load %arg3[%c152, %c0_4] : memref<248x256xf32, #tpu.memory_space<vmem>>, vector<32x96xf32>
    %c184 = arith.constant 184 : index
    %c0_5 = arith.constant 0 : index
    %7 = vector.load %arg3[%c184, %c0_5] : memref<248x256xf32, #tpu.memory_space<vmem>>, vector<32x112xf32>
    %c216 = arith.constant 216 : index
    %c0_6 = arith.constant 0 : index
    %8 = vector.load %arg3[%c216, %c0_6] : memref<248x256xf32, #tpu.memory_space<vmem>>, vector<16x48xf32>
    %c232 = arith.constant 232 : index
    %c0_7 = arith.constant 0 : index
    %9 = vector.load %arg3[%c232, %c0_7] : memref<248x256xf32, #tpu.memory_space<vmem>>, vector<16x32xf32>
    %c0_8 = arith.constant 0 : index
    %c0_9 = arith.constant 0 : index
    %10 = vector.load %arg4[%c0_8, %c0_9] : memref<9x256xf32, #tpu.memory_space<vmem>>, vector<1x192xf32>
    %c1 = arith.constant 1 : index
    %c0_10 = arith.constant 0 : index
    %11 = vector.load %arg4[%c1, %c0_10] : memref<9x256xf32, #tpu.memory_space<vmem>>, vector<1x64xf32>
    %c2 = arith.constant 2 : index
    %c0_11 = arith.constant 0 : index
    %12 = vector.load %arg4[%c2, %c0_11] : memref<9x256xf32, #tpu.memory_space<vmem>>, vector<1x96xf32>
    %c3 = arith.constant 3 : index
    %c0_12 = arith.constant 0 : index
    %13 = vector.load %arg4[%c3, %c0_12] : memref<9x256xf32, #tpu.memory_space<vmem>>, vector<1x32xf32>
    %c4 = arith.constant 4 : index
    %c0_13 = arith.constant 0 : index
    %14 = vector.load %arg4[%c4, %c0_13] : memref<9x256xf32, #tpu.memory_space<vmem>>, vector<1x24xf32>
    %c5 = arith.constant 5 : index
    %c0_14 = arith.constant 0 : index
    %15 = vector.load %arg4[%c5, %c0_14] : memref<9x256xf32, #tpu.memory_space<vmem>>, vector<1x48xf32>
    %c6 = arith.constant 6 : index
    %c0_15 = arith.constant 0 : index
    %16 = vector.load %arg4[%c6, %c0_15] : memref<9x256xf32, #tpu.memory_space<vmem>>, vector<1x16xf32>
    %c7 = arith.constant 7 : index
    %c0_16 = arith.constant 0 : index
    %17 = vector.load %arg4[%c7, %c0_16] : memref<9x256xf32, #tpu.memory_space<vmem>>, vector<1x64xf32>
    %c8 = arith.constant 8 : index
    %c0_17 = arith.constant 0 : index
    %18 = vector.load %arg4[%c8, %c0_17] : memref<9x256xf32, #tpu.memory_space<vmem>>, vector<1x32xf32>
    %c0_18 = arith.constant 0 : index
    %c0_19 = arith.constant 0 : index
    %19 = vector.load %arg6[%c0_18, %c0_19] : memref<2x112xf32, #tpu.memory_space<vmem>>, vector<2x112xf32>
    %20 = vector.extract_strided_slice %19 {offsets = [0, 0], sizes = [2, 64], strides = [1, 1]} : vector<2x112xf32> to vector<2x64xf32>
    %21 = vector.extract_strided_slice %19 {offsets = [0, 64], sizes = [2, 32], strides = [1, 1]} : vector<2x112xf32> to vector<2x32xf32>
    %22 = vector.extract_strided_slice %19 {offsets = [0, 96], sizes = [2, 16], strides = [1, 1]} : vector<2x112xf32> to vector<2x16xf32>
    %c0_i32_20 = arith.constant 0 : i32
    %c32_i32 = arith.constant 32 : i32
    %23 = arith.addi %c0_i32_20, %c32_i32 : i32
    %c1_i32 = arith.constant 1 : i32
    %24:3 = scf.for %arg7 = %c0_i32_20 to %23 step %c1_i32 iter_args(%arg8 = %20, %arg9 = %21, %arg10 = %22) -> (vector<2x64xf32>, vector<2x32xf32>, vector<2x16xf32>)  : i32 {
      %28 = arith.index_cast %arg7 : i32 to index
      %c0_26 = arith.constant 0 : index
      %c0_27 = arith.constant 0 : index
      %29 = vector.load %arg1[%28, %c0_26, %c0_27] : memref<32x2x24xf32, #tpu.memory_space<vmem>>, vector<1x2x24xf32>
      %30 = vector.shape_cast %29 : vector<1x2x24xf32> to vector<2x24xf32>
      %cst = arith.constant dense<0.000000e+00> : vector<2x192xf32>
      %31 = tpu.matmul %30, %3, %cst {dimension_numbers = #tpu.dot_dimension_numbers<[1], [0], [0], [1], [0, 0, 1, 1], [], []>} : vector<2x24xf32>, vector<24x192xf32>, vector<2x192xf32> -> vector<2x192xf32>
      %32 = vector.broadcast %10 : vector<1x192xf32> to vector<2x192xf32>
      %33 = arith.addf %31, %32 : vector<2x192xf32>
      %cst_28 = arith.constant dense<0.000000e+00> : vector<2x192xf32>
      %34 = tpu.matmul %arg8, %4, %cst_28 {dimension_numbers = #tpu.dot_dimension_numbers<[1], [0], [0], [1], [0, 0, 1, 1], [], []>} : vector<2x64xf32>, vector<64x192xf32>, vector<2x192xf32> -> vector<2x192xf32>
      %35 = vector.extract_strided_slice %33 {offsets = [0, 0], sizes = [2, 64], strides = [1, 1]} : vector<2x192xf32> to vector<2x64xf32>
      %36 = vector.extract_strided_slice %34 {offsets = [0, 0], sizes = [2, 64], strides = [1, 1]} : vector<2x192xf32> to vector<2x64xf32>
      %37 = arith.addf %35, %36 : vector<2x64xf32>
      %38 = arith.negf %37 : vector<2x64xf32>
      %39 = math.exp %38 : vector<2x64xf32>
      %cst_29 = arith.constant 1.000000e+00 : f32
      %40 = vector.broadcast %cst_29 : f32 to vector<2x64xf32>
      %41 = arith.addf %40, %39 : vector<2x64xf32>
      %42 = arith.divf %40, %41 : vector<2x64xf32>
      %43 = vector.extract_strided_slice %33 {offsets = [0, 64], sizes = [2, 64], strides = [1, 1]} : vector<2x192xf32> to vector<2x64xf32>
      %44 = vector.extract_strided_slice %34 {offsets = [0, 64], sizes = [2, 64], strides = [1, 1]} : vector<2x192xf32> to vector<2x64xf32>
      %45 = arith.addf %43, %44 : vector<2x64xf32>
      %46 = arith.negf %45 : vector<2x64xf32>
      %47 = math.exp %46 : vector<2x64xf32>
      %cst_30 = arith.constant 1.000000e+00 : f32
      %48 = vector.broadcast %cst_30 : f32 to vector<2x64xf32>
      %49 = arith.addf %48, %47 : vector<2x64xf32>
      %50 = arith.divf %48, %49 : vector<2x64xf32>
      %51 = vector.extract_strided_slice %33 {offsets = [0, 128], sizes = [2, 64], strides = [1, 1]} : vector<2x192xf32> to vector<2x64xf32>
      %52 = vector.extract_strided_slice %34 {offsets = [0, 128], sizes = [2, 64], strides = [1, 1]} : vector<2x192xf32> to vector<2x64xf32>
      %53 = vector.broadcast %11 : vector<1x64xf32> to vector<2x64xf32>
      %54 = arith.addf %52, %53 : vector<2x64xf32>
      %55 = arith.mulf %42, %54 : vector<2x64xf32>
      %56 = arith.addf %51, %55 : vector<2x64xf32>
      %57 = math.tanh %56 : vector<2x64xf32>
      %cst_31 = arith.constant 1.000000e+00 : f32
      %58 = vector.broadcast %cst_31 : f32 to vector<2x64xf32>
      %59 = arith.subf %58, %50 : vector<2x64xf32>
      %60 = arith.mulf %59, %57 : vector<2x64xf32>
      %61 = arith.mulf %50, %arg8 : vector<2x64xf32>
      %62 = arith.addf %60, %61 : vector<2x64xf32>
      %cst_32 = arith.constant dense<0.000000e+00> : vector<2x120xf32>
      %63 = tpu.matmul %62, %5, %cst_32 {dimension_numbers = #tpu.dot_dimension_numbers<[1], [0], [0], [1], [0, 0, 1, 1], [], []>} : vector<2x64xf32>, vector<64x120xf32>, vector<2x120xf32> -> vector<2x120xf32>
      %64 = vector.extract_strided_slice %63 {offsets = [0, 0], sizes = [2, 96], strides = [1, 1]} : vector<2x120xf32> to vector<2x96xf32>
      %65 = vector.broadcast %12 : vector<1x96xf32> to vector<2x96xf32>
      %66 = arith.addf %64, %65 : vector<2x96xf32>
      %67 = vector.extract_strided_slice %63 {offsets = [0, 96], sizes = [2, 24], strides = [1, 1]} : vector<2x120xf32> to vector<2x24xf32>
      %68 = vector.broadcast %14 : vector<1x24xf32> to vector<2x24xf32>
      %69 = arith.addf %67, %68 : vector<2x24xf32>
      %70 = arith.index_cast %arg7 : i32 to index
      %c0_33 = arith.constant 0 : index
      %c0_34 = arith.constant 0 : index
      %71 = vector.load %arg5[%70, %c0_33, %c0_34] : memref<32x2x24xf32, #tpu.memory_space<vmem>>, vector<1x2x24xf32>
      %72 = vector.shape_cast %71 : vector<1x2x24xf32> to vector<2x24xf32>
      %73 = vector.shape_cast %69 : vector<2x24xf32> to vector<1x2x24xf32>
      tpu.vector_store %arg5[%70, %c0_33, %c0_34], %73 {strides = array<i32>} : memref<32x2x24xf32, #tpu.memory_space<vmem>>, vector<1x2x24xf32>,
      %cst_35 = arith.constant dense<0.000000e+00> : vector<2x96xf32>
      %74 = tpu.matmul %arg9, %6, %cst_35 {dimension_numbers = #tpu.dot_dimension_numbers<[1], [0], [0], [1], [0, 0, 1, 1], [], []>} : vector<2x32xf32>, vector<32x96xf32>, vector<2x96xf32> -> vector<2x96xf32>
      %75 = vector.extract_strided_slice %66 {offsets = [0, 0], sizes = [2, 32], strides = [1, 1]} : vector<2x96xf32> to vector<2x32xf32>
      %76 = vector.extract_strided_slice %74 {offsets = [0, 0], sizes = [2, 32], strides = [1, 1]} : vector<2x96xf32> to vector<2x32xf32>
      %77 = arith.addf %75, %76 : vector<2x32xf32>
      %78 = arith.negf %77 : vector<2x32xf32>
      %79 = math.exp %78 : vector<2x32xf32>
      %cst_36 = arith.constant 1.000000e+00 : f32
      %80 = vector.broadcast %cst_36 : f32 to vector<2x32xf32>
      %81 = arith.addf %80, %79 : vector<2x32xf32>
      %82 = arith.divf %80, %81 : vector<2x32xf32>
      %83 = vector.extract_strided_slice %66 {offsets = [0, 32], sizes = [2, 32], strides = [1, 1]} : vector<2x96xf32> to vector<2x32xf32>
      %84 = vector.extract_strided_slice %74 {offsets = [0, 32], sizes = [2, 32], strides = [1, 1]} : vector<2x96xf32> to vector<2x32xf32>
      %85 = arith.addf %83, %84 : vector<2x32xf32>
      %86 = arith.negf %85 : vector<2x32xf32>
      %87 = math.exp %86 : vector<2x32xf32>
      %cst_37 = arith.constant 1.000000e+00 : f32
      %88 = vector.broadcast %cst_37 : f32 to vector<2x32xf32>
      %89 = arith.addf %88, %87 : vector<2x32xf32>
      %90 = arith.divf %88, %89 : vector<2x32xf32>
      %91 = vector.extract_strided_slice %66 {offsets = [0, 64], sizes = [2, 32], strides = [1, 1]} : vector<2x96xf32> to vector<2x32xf32>
      %92 = vector.extract_strided_slice %74 {offsets = [0, 64], sizes = [2, 32], strides = [1, 1]} : vector<2x96xf32> to vector<2x32xf32>
      %93 = vector.broadcast %13 : vector<1x32xf32> to vector<2x32xf32>
      %94 = arith.addf %92, %93 : vector<2x32xf32>
      %95 = arith.mulf %82, %94 : vector<2x32xf32>
      %96 = arith.addf %91, %95 : vector<2x32xf32>
      %97 = math.tanh %96 : vector<2x32xf32>
      %cst_38 = arith.constant 1.000000e+00 : f32
      %98 = vector.broadcast %cst_38 : f32 to vector<2x32xf32>
      %99 = arith.subf %98, %90 : vector<2x32xf32>
      %100 = arith.mulf %99, %97 : vector<2x32xf32>
      %101 = arith.mulf %90, %arg9 : vector<2x32xf32>
      %102 = arith.addf %100, %101 : vector<2x32xf32>
      %cst_39 = arith.constant dense<0.000000e+00> : vector<2x112xf32>
      %103 = tpu.matmul %102, %7, %cst_39 {dimension_numbers = #tpu.dot_dimension_numbers<[1], [0], [0], [1], [0, 0, 1, 1], [], []>} : vector<2x32xf32>, vector<32x112xf32>, vector<2x112xf32> -> vector<2x112xf32>
      %104 = vector.extract_strided_slice %103 {offsets = [0, 0], sizes = [2, 48], strides = [1, 1]} : vector<2x112xf32> to vector<2x48xf32>
      %105 = vector.broadcast %15 : vector<1x48xf32> to vector<2x48xf32>
      %106 = arith.addf %104, %105 : vector<2x48xf32>
      %107 = vector.extract_strided_slice %103 {offsets = [0, 48], sizes = [2, 64], strides = [1, 1]} : vector<2x112xf32> to vector<2x64xf32>
      %108 = vector.broadcast %17 : vector<1x64xf32> to vector<2x64xf32>
      %109 = arith.addf %107, %108 : vector<2x64xf32>
      %cst_40 = arith.constant dense<0.000000e+00> : vector<2x48xf32>
      %110 = tpu.matmul %arg10, %8, %cst_40 {dimension_numbers = #tpu.dot_dimension_numbers<[1], [0], [0], [1], [0, 0, 1, 1], [], []>} : vector<2x16xf32>, vector<16x48xf32>, vector<2x48xf32> -> vector<2x48xf32>
      %111 = vector.extract_strided_slice %106 {offsets = [0, 0], sizes = [2, 16], strides = [1, 1]} : vector<2x48xf32> to vector<2x16xf32>
      %112 = vector.extract_strided_slice %110 {offsets = [0, 0], sizes = [2, 16], strides = [1, 1]} : vector<2x48xf32> to vector<2x16xf32>
      %113 = arith.addf %111, %112 : vector<2x16xf32>
      %114 = arith.negf %113 : vector<2x16xf32>
      %115 = math.exp %114 : vector<2x16xf32>
      %cst_41 = arith.constant 1.000000e+00 : f32
      %116 = vector.broadcast %cst_41 : f32 to vector<2x16xf32>
      %117 = arith.addf %116, %115 : vector<2x16xf32>
      %118 = arith.divf %116, %117 : vector<2x16xf32>
      %119 = vector.extract_strided_slice %106 {offsets = [0, 16], sizes = [2, 16], strides = [1, 1]} : vector<2x48xf32> to vector<2x16xf32>
      %120 = vector.extract_strided_slice %110 {offsets = [0, 16], sizes = [2, 16], strides = [1, 1]} : vector<2x48xf32> to vector<2x16xf32>
      %121 = arith.addf %119, %120 : vector<2x16xf32>
      %122 = arith.negf %121 : vector<2x16xf32>
      %123 = math.exp %122 : vector<2x16xf32>
      %cst_42 = arith.constant 1.000000e+00 : f32
      %124 = vector.broadcast %cst_42 : f32 to vector<2x16xf32>
      %125 = arith.addf %124, %123 : vector<2x16xf32>
      %126 = arith.divf %124, %125 : vector<2x16xf32>
      %127 = vector.extract_strided_slice %106 {offsets = [0, 32], sizes = [2, 16], strides = [1, 1]} : vector<2x48xf32> to vector<2x16xf32>
      %128 = vector.extract_strided_slice %110 {offsets = [0, 32], sizes = [2, 16], strides = [1, 1]} : vector<2x48xf32> to vector<2x16xf32>
      %129 = vector.broadcast %16 : vector<1x16xf32> to vector<2x16xf32>
      %130 = arith.addf %128, %129 : vector<2x16xf32>
      %131 = arith.mulf %118, %130 : vector<2x16xf32>
      %132 = arith.addf %127, %131 : vector<2x16xf32>
      %133 = math.tanh %132 : vector<2x16xf32>
      %cst_43 = arith.constant 1.000000e+00 : f32
      %134 = vector.broadcast %cst_43 : f32 to vector<2x16xf32>
      %135 = arith.subf %134, %126 : vector<2x16xf32>
      %136 = arith.mulf %135, %133 : vector<2x16xf32>
      %137 = arith.mulf %126, %arg10 : vector<2x16xf32>
      %138 = arith.addf %136, %137 : vector<2x16xf32>
      %cst_44 = arith.constant dense<0.000000e+00> : vector<2x32xf32>
      %139 = tpu.matmul %138, %9, %cst_44 {dimension_numbers = #tpu.dot_dimension_numbers<[1], [0], [0], [1], [0, 0, 1, 1], [], []>} : vector<2x16xf32>, vector<16x32xf32>, vector<2x32xf32> -> vector<2x32xf32>
      %140 = vector.broadcast %18 : vector<1x32xf32> to vector<2x32xf32>
      %141 = arith.addf %139, %140 : vector<2x32xf32>
      scf.yield %109, %141, %138 : vector<2x64xf32>, vector<2x32xf32>, vector<2x16xf32>
    }
    %c32_i32_21 = arith.constant 32 : i32
    %c0_22 = arith.constant 0 : index
    %c0_23 = arith.constant 0 : index
    %25 = vector.load %arg6[%c0_22, %c0_23] : memref<2x112xf32, #tpu.memory_space<vmem>>, vector<2x64xf32>
    tpu.vector_store %arg6[%c0_22, %c0_23], %24#0 {strides = array<i32>} : memref<2x112xf32, #tpu.memory_space<vmem>>, vector<2x64xf32>,
    %c0_24 = arith.constant 0 : index
    %c64 = arith.constant 64 : index
    %26 = vector.load %arg6[%c0_24, %c64] : memref<2x112xf32, #tpu.memory_space<vmem>>, vector<2x32xf32>
    tpu.vector_store %arg6[%c0_24, %c64], %24#1 {strides = array<i32>} : memref<2x112xf32, #tpu.memory_space<vmem>>, vector<2x32xf32>,
    %c0_25 = arith.constant 0 : index
    %c96 = arith.constant 96 : index
    %27 = vector.load %arg6[%c0_25, %c96] : memref<2x112xf32, #tpu.memory_space<vmem>>, vector<2x16xf32>
    tpu.vector_store %arg6[%c0_25, %c96], %24#2 {strides = array<i32>} : memref<2x112xf32, #tpu.memory_space<vmem>>, vector<2x16xf32>,
    return
  }
  func.func @transform_0(%arg0: i32) -> (i32, i32, i32) {
    %c0_i32 = arith.constant 0 : i32
    %c0_i32_0 = arith.constant 0 : i32
    %c0_i32_1 = arith.constant 0 : i32
    return %arg0, %c0_i32, %c0_i32_0 : i32, i32, i32
  }
  func.func @transform_1(%arg0: i32) -> (i32, i32) {
    %c0_i32 = arith.constant 0 : i32
    %c0_i32_0 = arith.constant 0 : i32
    %c0_i32_1 = arith.constant 0 : i32
    return %c0_i32, %c0_i32_0 : i32, i32
  }
  func.func @transform_2(%arg0: i32) -> (i32, i32) {
    %c0_i32 = arith.constant 0 : i32
    %c0_i32_0 = arith.constant 0 : i32
    %c0_i32_1 = arith.constant 0 : i32
    return %c0_i32, %c0_i32_0 : i32, i32
  }
  func.func @transform_3(%arg0: i32) -> (i32, i32) {
    %c0_i32 = arith.constant 0 : i32
    %c0_i32_0 = arith.constant 0 : i32
    %c0_i32_1 = arith.constant 0 : i32
    return %c0_i32, %c0_i32_0 : i32, i32
  }
  func.func @transform_4(%arg0: i32) -> (i32, i32, i32) {
    %c0_i32 = arith.constant 0 : i32
    %c0_i32_0 = arith.constant 0 : i32
    %c0_i32_1 = arith.constant 0 : i32
    return %arg0, %c0_i32, %c0_i32_0 : i32, i32, i32
  }
  func.func @transform_5(%arg0: i32) -> (i32, i32) {
    %c0_i32 = arith.constant 0 : i32
    %c0_i32_0 = arith.constant 0 : i32
    %c0_i32_1 = arith.constant 0 : i32
    return %c0_i32, %c0_i32_0 : i32, i32
  }
}

</mosaic_0001>

<bundles_post_ra>
// kernel: tpu_custom_call.1
= control target key start
LH: loop header
LB: loop body
LE: loop exit
PB: predicated region body
PF: predicated region fallthrough
CT: control target
= control target key end

     0   :  { %11 = vsyncpa [#allocation3], 0  ;;  %s1373_s0 = inlined_call_operand.vmem [shape: f32[96,2,24], index: 0, kind: input, shape index: {}]   ;;  %s1374_s1 = inlined_call_operand.vmem [shape: f32[2,112], index: 1, kind: input, shape index: {}]   ;;  %s1375_s2 = inlined_call_operand.hbm [shape: f32[248,256], index: 2, kind: input, shape index: {}]   ;;  %s1376_s3 = inlined_call_operand.vmem [shape: f32[9,256], index: 3, kind: input, shape index: {}]   ;;  %s1377_s4 = inlined_call_operand.vmem [shape: f32[96,2,24], index: 4, kind: output, shape index: {0}]   ;;  %s1378_s5 = inlined_call_operand.hbm [shape: f32[2,112], index: 5, kind: output, shape index: {1}]  }
   0x1   :  { %12 = vsyncpa [#allocation4], 0  ;;  %s1084_s18 = smov 0  }
   0x2 LB: > { %s173_s21 = sshll.u32 %s1375_s2, 4  ;;  %s1093_s22 = sadd.s32 4294967295, %s1022_s18   ;;  %s1022_s18 = sphi %s1084_s18, %s18_s18   ;;  %s174_s21 = int_to_ptr.hbm [resolvable:$true] %s173_s21 }
   0x3   : > { %p819_p0 = scmp.ge.s32.totalorder %s1022_s18, 1  ;;  %p159_p1 = scmp.lt.s32.totalorder %s1022_s18, 4 }
   0x4   : > { %p820_p2 = scmp.ne.s32.totalorder %s1093_s22, 0  ;;  %p858_p3 = scmp.eq.s32.totalorder %s1093_s22, 0 }
   0x5   : > { %p160_p4 = pnand %p819_p0, %p159_p1  ;;  %s1040_s23 = smov [#allocation2]  }
   0x6   : > { %s175_s24 = sshll.u32 %s1040_s23, 4  ;;  %s1041_s25 = smov 256   ;;  %s176_s24 = int_to_ptr.vmem [resolvable:$true] %s175_s24 }
   0x7   : > { %p854_p5 = pneg %p160_p4  ;;  %s1042_s26 = smov 16  }
   0x8   : > { %203 = sbr.rel (%p160_p4) target bundleno = 1783 (0x6f7), region = 36 }
   0x9   : > { %p855_p6 = pnand %p858_p3, %p854_p5 }
   0xb   : > { %857 = dma.hbm_to_vmem [thread:$0]  (!%p855_p6), %s174_s21, 7936, %s176_s24, [#allocation3], %s1041_s25, %s1041_s25, %s1042_s26  }
   0xd   : > { %1013 = dma.done.wait (%p858_p3), [#allocation3], 7936  }
   0xe   : > { %1015 = vsyncadd (%p858_p3), [#allocation3], 4294959360  ;;  %s824_s27 = sshll.u32 %s1093_s22, 5 }
   0xf   : > { %p233_p7 = scmp.lt.s32.totalorder %s824_s27, 95  ;;  %247 = sbr.rel (%p820_p2) target bundleno = 22 (0x16), region = 44 }
  0x11   : > { %s1399_s27 = smov (!%p233_p7, %s824_s27), 95 }
  0x12   : > { %s825_s28 = sshll.u32 %s1399_s27, 1 }
  0x13   : > { %s1103_s6 = scalar_lea.vmem %s1373_s0, %s825_s28  ;;  %s1108_s9 = scalar_lea.vmem %s1377_s4, %s825_s28 }
  0x14   : > { %v248_v0 = vld [vmem:[%s1374_s1] sm:$0x3]  ;;  %vm249_vm0 = vcmask 910336  }
  0x15   : > { %250 = vst.msk [vmem:[#allocation5] sm:$0x3] %vm249_vm0, %v248_v0 }
  0x16 PF: > { %s1043_s12 = smov 64   ;;  %s1044_s13 = smov 32   ;;  %v1116_v2 = vld [vmem:[#allocation2] sm:$0xff]  ;;  %v1118_v3 = vld [vmem:[#allocation2 + $0x8] sm:$0xff]  ;;  %v1120_v4 = vld [vmem:[#allocation2 + $0x10] sm:$0xff] }
  0x17   : > { %1379 = vst [vmem:[#allocation8_spill] sm:$0xff] %v1116_v2  ;;  %v1122_v5 = vld [vmem:[#allocation2 + $0x18] sm:$0xff]  ;;  %v1124_v6 = vld [vmem:[#allocation2 + $0x20] sm:$0xff]  ;;  %v1126_v7 = vld [vmem:[#allocation2 + $0x28] sm:$0xff]  ;;  %s1251_s11 = smov 0  }
  0x18   : > { %1380 = vst [vmem:[#allocation9_spill] sm:$0xff] %v1118_v3  ;;  %v1128_v8 = vld [vmem:[#allocation2 + $0x30] sm:$0xff]  ;;  %v1130_v9 = vld [vmem:[#allocation2 + $0x38] sm:$0xff]  ;;  %v1132_v10 = vld [vmem:[#allocation2 + $0x40] sm:$0xff] }
  0x19   : > { %1381 = vst [vmem:[#allocation10_spill] sm:$0xff] %v1120_v4  ;;  %v1134_v11 = vld [vmem:[#allocation2 + $0x48] sm:$0xff]  ;;  %v1136_v12 = vld [vmem:[#allocation2 + $0x50] sm:$0xff]  ;;  %v1138_v13 = vld [vmem:[#allocation2 + $0x58] sm:$0xff] }
  0x1a   : > { %1382 = vst [vmem:[#allocation11_spill] sm:$0xff] %v1122_v5  ;;  %v1140_v14 = vld [vmem:[#allocation2 + $0x60] sm:$0xff]  ;;  %v1142_v15 = vld [vmem:[#allocation2 + $0x68] sm:$0xff]  ;;  %v1144_v16 = vld [vmem:[#allocation2 + $0x70] sm:$0xff] }
  0x1b   : > { %1383 = vst [vmem:[#allocation12_spill] sm:$0xff] %v1124_v6  ;;  %v1146_v17 = vld [vmem:[#allocation2 + $0x78] sm:$0xff]  ;;  %v1148_v18 = vld [vmem:[#allocation2 + $0x80] sm:$0xff]  ;;  %v1150_v19 = vld [vmem:[#allocation2 + $0x88] sm:$0xff] }
  0x1c   : > { %v302_v1 = vld [vmem:[#allocation5] sm:$0x3]   ;;  %1384 = vst [vmem:[#allocation13_spill] sm:$0xff] %v1126_v7  ;;  %v1154_v21 = vld [vmem:[#allocation2 + $0x98] sm:$0xff]  ;;  %v1156_v22 = vld [vmem:[#allocation2 + $0xa0] sm:$0xff] }
  0x1d   : > { %304 = vrot.lane.b32.xlu0 %v302_v1, %s1043_s12  ;;  %1385 = vst [vmem:[#allocation14_spill] sm:$0xff] %v1128_v8  ;;  %v1152_v20 = vld [vmem:[#allocation2 + $0x90] sm:$0xff]  ;;  %v1158_v23 = vld [vmem:[#allocation2 + $0xa8] sm:$0xff]  ;;  %v1162_v25 = vld [vmem:[#allocation2 + $0xc0] sm:$0xff] }
  0x1e   : > { %1386 = vst [vmem:[#allocation15_spill] sm:$0xff] %v1130_v9  ;;  %v1160_v24 = vld [vmem:[#allocation2 + $0xb0] sm:$0xff]  ;;  %v1166_v27 = vld [vmem:[#allocation2 + $0xe0] sm:$0xff] }
  0x1f   : > { %v1164_v26 = vld [vmem:[#allocation2 + $0xd0] sm:$0xff]  ;;  %v1170_v29 = vld [vmem:[#allocation2 + $0x100] sm:$0xff] }
  0x20   : > { %v1168_v28 = vld [vmem:[#allocation2 + $0xf0] sm:$0xff]  ;;  %v1174_v31 = vld [vmem:[#allocation2 + $0x120] sm:$0xff] }
  0x21   : > { %v1172_v30 = vld [vmem:[#allocation2 + $0x110] sm:$0xff]  ;;  %v1178_v33 = vld [vmem:[#allocation2 + $0x140] sm:$0xff] }
  0x22   : > { %v1176_v32 = vld [vmem:[#allocation2 + $0x130] sm:$0xff]  ;;  %v1182_v35 = vld [vmem:[#allocation2 + $0x160] sm:$0xff] }
  0x23   : > { %v1180_v34 = vld [vmem:[#allocation2 + $0x150] sm:$0xff]  ;;  %v1186_v37 = vld [vmem:[#allocation2 + $0x180] sm:$0xff] }
  0x24   : > { %v1184_v36 = vld [vmem:[#allocation2 + $0x170] sm:$0xff]  ;;  %v1190_v39 = vld [vmem:[#allocation2 + $0x1a0] sm:$0xff] }
  0x25   : > { %307 = vrot.lane.b32.xlu0 %v302_v1, %s1044_s13  ;;  %v1188_v38 = vld [vmem:[#allocation2 + $0x190] sm:$0xff]  ;;  %v1194_v41 = vld [vmem:[#allocation2 + $0x1c0] sm:$0xff] }
  0x26   : > { %v1192_v40 = vld [vmem:[#allocation2 + $0x1b0] sm:$0xff]  ;;  %v1198_v43 = vld [vmem:[#allocation2 + $0x1e0] sm:$0xff] }
  0x27   : > { %v1196_v42 = vld [vmem:[#allocation2 + $0x1d0] sm:$0xff]  ;;  %v1203_v44 = vld [vmem:[%s1376_s3] ss:$8 sm:$0x3]  ;;  %v1208_v45 = vld [vmem:[%s1376_s3 + $0x1] ss:$0 sm:$0xff] }
  0x28   : > { %v1213_v46 = vld [vmem:[%s1376_s3 + $0x2] ss:$0 sm:$0xff]  ;;  %v1218_v47 = vld [vmem:[%s1376_s3 + $0x3] ss:$0 sm:$0xff]  ;;  %v1223_v48 = vld [vmem:[%s1376_s3 + $0x4] ss:$0 sm:$0xff] }
  0x29   : > { %v1228_v49 = vld [vmem:[%s1376_s3 + $0x5] ss:$0 sm:$0xff]  ;;  %v1233_v50 = vld [vmem:[%s1376_s3 + $0x6] ss:$0 sm:$0xff]  ;;  %v1238_v51 = vld [vmem:[%s1376_s3 + $0x7] ss:$0 sm:$0xff] }
  0x2a   : > { %v1243_v52 = vld [vmem:[%s1376_s3 + $0x10] ss:$0 sm:$0xff] }
  0x8f   : > { %v305_v53 = vpop.permute.xlu0 %304  }
  0x97   : > { %v308_v54 = vpop.permute.xlu0 %307  }
  0x98 LB: >> { %383 = vmatpush.msra.mxu2 %v1156_v22  ;;  %v1387_v6 = vld [vmem:[#allocation12_spill] sm:$0xff]  ;;  %403 = vmatpush.msra.mxu3 %v1158_v23  ;;  %v1388_v7 = vld [vmem:[#allocation13_spill] sm:$0xff]  ;;  %v1389_v4 = vld [vmem:[#allocation10_spill] sm:$0xff]  ;;  %s829_s13 = sshll.u32 %s1038_s11, 1  ;;  %vm327_vm1 = vcmask 195584   ;;  %vm371_vm2 = vcmask 523264   ;;  %s1038_s11 = sphi %s1251_s11, %s315_s11   ;;  %v1034_v1 = vphi %v302_v1, %v1397_v1   ;;  %v1030_v53 = vphi %v305_v53, %v1396_v53   ;;  %v1026_v54 = vphi %v308_v54, %v1395_v54  }
  0x99   : >> { %344 = vmatpush.msra.mxu0 %v1387_v6  ;;  %364 = vmatpush.msra.mxu1 %v1388_v7  ;;  %s320_s14 = scalar_lea.vmem %s1103_s6, %s829_s13  ;;  %v1390_v5 = vld [vmem:[#allocation11_spill] sm:$0xff]  ;;  %v1391_v2 = vld [vmem:[#allocation8_spill] sm:$0xff]  ;;  %v1392_v3 = vld [vmem:[#allocation9_spill] sm:$0xff]  ;;  %v323_v56 = vperm.slane %v1203_v44, 0  ;;  %v324_v7 = vperm.slane %v1203_v44, 1  ;;  %s1045_s15 = smov 64  }
  0x9a   : >> { %384 = vmatpush.msra.mxu2 %v1152_v20  ;;  %404 = vmatpush.msra.mxu3 %v1154_v21  ;;  %v321_v55 = vld [vmem:[%s320_s14] sm:$0x3]  ;;  %v1393_v8 = vld [vmem:[#allocation14_spill] sm:$0xff]  ;;  %v1394_v9 = vld [vmem:[#allocation15_spill] sm:$0xff]  ;;  %vm488_vm7 = vcmask 261120   ;;  %s1046_s16 = smov 32   ;;  %s485_s24 = scalar_lea.vmem %s1108_s9, %s829_s13 }
  0x9b   : >> { %345 = vmatpush.msra.mxu0 %v1389_v4  ;;  %365 = vmatpush.msra.mxu1 %v1390_v5  ;;  %vm590_vm12 = vcmask 130048   ;;  %s1047_s17 = smov 96   ;;  %s1048_s19 = smov 16  }
  0x9c   : >> { %385 = vmatpush.msra.mxu2 %v1148_v18  ;;  %405 = vmatpush.msra.mxu3 %v1150_v19  ;;  %s1049_s20 = smov 48   ;;  %s1050_s21 = smov 112  }
  0x9d   : >> { %346 = vmatpush.msra.mxu0 %v1391_v2  ;;  %366 = vmatpush.msra.mxu1 %v1392_v3  ;;  %s1051_s23 = smov 80   ;;  %s315_s11 = sadd.s32 1, %s1038_s11  }
  0x9e   : >> { %830 = vmatmul.msk.f32.vlgmr.msra.gmra.mxu0 %vm327_vm1, %v321_v55  ;;  %386 = vmatpush.msra.mxu2 %v1144_v16  ;;  %p312_p8 = scmp.ge.s32.totalorder %s315_s11, 32  }
  0x9f   : >> { %406 = vmatpush.msra.mxu3 %v1146_v17  ;;  %831 = vmatmul.msk.f32.vlgmr.msra.gmra.mxu1 %vm327_vm1, %v321_v55  ;;  %vm486_vm1 = vcmask 189440   ;;  %s1052_s25 = smov (%p312_p8), 96   ;;  %s1053_s26 = smov (%p312_p8), [#allocation5]  }
  0xa0   : >> { %387 = vmatpush.msra.mxu2 %v1140_v14  ;;  %504 = vmatpush.msrb.mxu1 %v1182_v35  ;;  %s720_s27 = sshll.u32 (%p312_p8), %s1053_s26, 4  ;;  %s722_s30 = sshll.u32 (%p312_p8), %s1378_s5, 4  ;;  %s721_s27 = int_to_ptr.vmem [resolvable:$true] %s720_s27  ;;  %s723_s30 = int_to_ptr.hbm [resolvable:$true] %s722_s30 }
  0xa1   : >> { %407 = vmatpush.msra.mxu3 %v1142_v15  ;;  %463 = vmatpush.msrb.mxu0 %v1174_v31  ;;  %p860_p9 = scmp.eq.s32.totalorder (%p312_p8), %s1093_s22, 2 }
  0xa2   : >> { %388 = vmatpush.msra.mxu2 %v1136_v12  ;;  %505 = vmatpush.msrb.mxu1 %v1180_v34 }
  0xa3   : >> { %408 = vmatpush.msra.mxu3 %v1138_v13  ;;  %464 = vmatpush.msrb.mxu0 %v1172_v30 }
  0xa4   : >> { %389 = vmatpush.msra.mxu2 %v1132_v10  ;;  %506 = vmatpush.msrb.mxu1 %v1178_v33 }
  0xa5   : >> { %409 = vmatpush.msra.mxu3 %v1134_v11  ;;  %465 = vmatpush.msrb.mxu0 %v1170_v29 }
  0xa6   : >> { %390 = vmatpush.msra.mxu2 %v1393_v8  ;;  %507 = vmatpush.msrb.mxu1 %v1176_v32 }
  0xa7   : >> { %832 = vmatmul.msk.f32.vlgmr.msra.gmra.mxu2 %vm371_vm2, %v1034_v1  ;;  %410 = vmatpush.msra.mxu3 %v1394_v9 }
  0xa8   : >> { %833 = vmatmul.msk.f32.vlgmr.msra.gmra.mxu3 %vm371_vm2, %v1034_v1  ;;  %466 = vmatpush.msrb.mxu0 %v1168_v28 }
  0xa9   : >> { %608 = vmatpush.msrb.mxu2 %v1194_v41  ;;  %576 = vmatpush.msra.mxu1 %v1190_v39 }
  0xaa   : >> { %467 = vmatpush.msrb.mxu0 %v1166_v27  ;;  %680 = vmatpush.msrb.mxu3 %v1198_v43 }
  0xab   : >> { %609 = vmatpush.msrb.mxu2 %v1192_v40  ;;  %577 = vmatpush.msra.mxu1 %v1188_v38 }
  0xac   : >> { %468 = vmatpush.msrb.mxu0 %v1164_v26  ;;  %681 = vmatpush.msrb.mxu3 %v1196_v42 }
  0xad   : >> { %578 = vmatpush.msra.mxu1 %v1186_v37 }
  0xae   : >> { %469 = vmatpush.msrb.mxu0 %v1162_v25  ;;  %836 = vmatmul.msk.f32.vlgmr.msrb.gmra.mxu1 %vm488_vm7, %v1030_v53 }
  0xaf   : >> { %579 = vmatpush.msra.mxu1 %v1184_v36  ;;  %839 = vmatmul.msk.f32.vlgmr.msrb.gmra.mxu2 %vm590_vm12, %v1026_v54 }
  0xb0   : >> { %470 = vmatpush.msrb.mxu0 %v1160_v24 }
 0x11b   : >> { %v348_v57 = vpop.f32.mrf.mxu0 }
 0x11c   : >> { %v349_v58 = vadd.f32 %v348_v57, %v323_v56  ;;  %v368_v8 = vpop.f32.mrf.mxu1 }
 0x12a   : >> { %v392_v59 = vpop.f32.mrf.mxu2 }
 0x12b   : >> { %v415_v60 = vadd.f32 %v392_v59, %v349_v58  ;;  %v412_v3 = vpop.f32.mrf.mxu3  ;;  %v369_v59 = vadd.f32 %v368_v8, %v324_v7  ;;  %v509_v8 = vpop.f32.mrf.mxu1 }
 0x12c   : >> { %v435_v56 = vadd.f32 %v412_v3, %v1208_v45 }
 0x12d   : >> { %v834_v61 = vmul.f32 -1.442695, %v415_v60 }
 0x12f   : >> { %916 = vpow2.f32 %v834_v61 }
 0x135   : >> { %v917_v62 = vpop.eup %916 }
 0x136   : >> { %v419_v63 = vadd.f32 1.0, %v917_v62 }
 0x138   : >> { %918 = vrcp.f32 %v419_v63  ;;  %v431_v4 = vand.u32 2147483648, %v419_v63  ;;  %v429_v6 = vand.u32 2147483647, %v419_v63  ;;  %vm425_vm4 = vweird.f32 %v419_v63 }
 0x13a   : >> { %v432_v57 = vor.u32 1.1754944e-38, %v431_v4  ;;  %vm430_vm6 = vcmp.eq.f32.partialorder %v429_v6, 8.507059e+37 }
 0x13e   : >> { %v919_v0 = vpop.eup %918 }
 0x13f   : >> { %v421_v55 = vmul.f32 %v919_v0, %v419_v63  ;;  %vm426_vm3 = vweird.f32 %v919_v0 }
 0x140   : >> { %vm427_vm5 = vmor %vm425_vm4, %vm426_vm3  ;;  %vm697_vm3 = vcmask (%p312_p8), 779776   ;;  %vm703_vm4 = vcmask (%p312_p8), 911104  }
 0x141   : >> { %v422_v2 = vsub.f32 1.0, %v421_v55 }
 0x143   : >> { %v423_v5 = vmul.f32 %v919_v0, %v422_v2 }
 0x145   : >> { %v424_v9 = vadd.f32 %v919_v0, %v423_v5 }
 0x147   : >> { %v428_v58 = vsel %vm427_vm5, %v919_v0, %v424_v9 }
 0x148   : >> { %v433_v60 = vsel %vm430_vm6, %v432_v57, %v428_v58 }
 0x149   : >> { %v436_v61 = vmul.f32 %v435_v56, %v433_v60  ;;  %v439_v3 = vsub.f32 1.0, %v433_v60 }
 0x14b   : >> { %v437_v62 = vadd.f32 %v436_v61, %v369_v59 }
 0x14d   : >> { %920 = vtanh.f32 %v437_v62 }
 0x153   : >> { %v921_v55 = vpop.eup %920 }
 0x154   : >> { %441 = vrot.lane.b32.xlu0 %v921_v55, %s1045_s15 }
 0x15c   : >> { %445 = vrot.lane.b32.xlu0 %v1034_v1, %s1045_s15 }
 0x1c6   : >> { %v442_v2 = vpop.permute.xlu0 %441 }
 0x1c7   : >> { %v444_v5 = vmul.f32 %v442_v2, %v439_v3 }
 0x1ce   : >> { %v446_v4 = vpop.permute.xlu0 %445 }
 0x1cf   : >> { %v448_v6 = vmul.f32 %v446_v4, %v433_v60 }
 0x1d1   : >> { %v449_v7 = vadd.f32 %v448_v6, %v444_v5 }
 0x1d3   : >> { %451 = vrot.lane.b32.xlu1 %v449_v7, %s1045_s15 }
 0x1db   : >> { %533 = vrot.lane.b32.xlu1 %v1218_v47, %s1045_s15 }
 0x1e3   : >> { %554 = vrot.lane.b32.xlu1 %v1030_v53, %s1046_s16 }
 0x245   : >> { %v452_v1 = vpop.permute.xlu1 %451 }
 0x246   : >> { %835 = vmatmul.msk.f32.vlgmr.msrb.gmra.mxu0 %vm371_vm2, %v452_v1  ;;  %vm691_vm2 = vcmask (%p312_p8), 517120  }
 0x24d   : >> { %v534_v9 = vpop.permute.xlu1 %533 }
 0x24e   : >> { %v536_v63 = vadd.f32 %v534_v9, %v509_v8 }
 0x250   : >> { %538 = vrot.lane.b32.xlu2 %v536_v63, %s1045_s15 }
 0x2aa   : >> { %v539_v6 = vpop.permute.xlu2 %538 }
 0x2c3   : >> { %v1330_v0 = vpop.f32.mrf.mxu0 }
 0x2c4   : >> { %v475_v56 = vadd.f32 %v1330_v0, %v1213_v46 }
 0x2c6   : >> { %v512_v57 = vadd.f32 %v509_v8, %v475_v56 }
 0x2c8   : >> { %v837_v58 = vmul.f32 -1.442695, %v512_v57 }
 0x2ca   : >> { %922 = vpow2.f32 %v837_v58  ;;  %v555_v58 = vpop.permute.xlu1 %554 }
 0x2d0   : >> { %v923_v59 = vpop.eup %922 }
 0x2d1   : >> { %v516_v60 = vadd.f32 1.0, %v923_v59 }
 0x2d3   : >> { %924 = vrcp.f32 %v516_v60  ;;  %v528_v55 = vand.u32 2147483648, %v516_v60  ;;  %v526_v3 = vand.u32 2147483647, %v516_v60  ;;  %vm522_vm9 = vweird.f32 %v516_v60 }
 0x2d5   : >> { %v529_v5 = vor.u32 1.1754944e-38, %v528_v55  ;;  %vm527_vm11 = vcmp.eq.f32.partialorder %v526_v3, 8.507059e+37  ;;  %v611_v55 = vpop.f32.mrf.mxu2 }
 0x2d9   : >> { %v925_v53 = vpop.eup %924 }
 0x2da   : >> { %v518_v61 = vmul.f32 %v925_v53, %v516_v60  ;;  %vm523_vm8 = vweird.f32 %v925_v53 }
 0x2db   : >> { %vm524_vm10 = vmor %vm522_vm9, %vm523_vm8 }
 0x2dc   : >> { %v519_v62 = vsub.f32 1.0, %v518_v61 }
 0x2de   : >> { %v520_v2 = vmul.f32 %v925_v53, %v519_v62 }
 0x2e0   : >> { %v521_v4 = vadd.f32 %v925_v53, %v520_v2 }
 0x2e2   : >> { %v525_v7 = vsel %vm524_vm10, %v925_v53, %v521_v4 }
 0x2e3   : >> { %v530_v1 = vsel %vm527_vm11, %v529_v5, %v525_v7 }
 0x2e4   : >> { %v541_v8 = vmul.f32 %v539_v6, %v530_v1  ;;  %v548_v59 = vsub.f32 1.0, %v530_v1  ;;  %v557_v53 = vmul.f32 %v555_v58, %v530_v1 }
 0x2e6   : >> { %543 = vrot.lane.b32.xlu2 %v541_v8, %s1045_s15 }
 0x340   : >> { %v544_v9 = vpop.permute.xlu2 %543 }
 0x341   : >> { %v546_v63 = vadd.f32 %v544_v9, %v475_v56 }
 0x343   : >> { %926 = vtanh.f32 %v546_v63 }
 0x349   : >> { %v927_v57 = vpop.eup %926 }
 0x34a   : >> { %550 = vrot.lane.b32.xlu0 %v927_v57, %s1047_s17 }
 0x352   : >> { %635 = vrot.lane.b32.xlu0 %v1233_v50, %s1046_s16 }
 0x3bc   : >> { %v551_v60 = vpop.permute.xlu0 %550 }
 0x3bd   : >> { %v553_v61 = vmul.f32 %v551_v60, %v548_v59 }
 0x3bf   : >> { %v558_v62 = vadd.f32 %v557_v53, %v553_v61 }
 0x3c1   : >> { %560 = vrot.lane.b32.xlu2 %v558_v62, %s1047_s17 }
 0x3c4   : >> { %v636_v2 = vpop.permute.xlu0 %635 }
 0x3c5   : >> { %v638_v3 = vadd.f32 %v636_v2, %v611_v55 }
 0x3c7   : >> { %640 = vrot.lane.b32.xlu1 %v638_v3, %s1047_s17 }
 0x3cf   : >> { %656 = vrot.lane.b32.xlu1 %v1026_v54, %s1048_s19 }
 0x3d7   : >> { %586 = vrot.lane.b32.xlu1 %v1238_v51, %s1049_s20 }
 0x41b   : >> { %v561_v56 = vpop.permute.xlu2 %560 }
 0x41c   : >> { %838 = vmatmul.msk.f32.vlgmr.msra.gmra.mxu1 %vm488_vm7, %v561_v56 }
 0x439   : >> { %v641_v62 = vpop.permute.xlu1 %640 }
 0x499   : >> { %v581_v4 = vpop.f32.mrf.mxu1 }
 0x49a   : >> { %v584_v5 = vadd.f32 %v581_v4, %v1228_v49 }
 0x49c   : >> { %v614_v6 = vadd.f32 %v611_v55, %v584_v5 }
 0x49e   : >> { %v840_v7 = vmul.f32 -1.442695, %v614_v6 }
 0x4a0   : >> { %928 = vpow2.f32 %v840_v7  ;;  %v657_v7 = vpop.permute.xlu1 %656 }
 0x4a6   : >> { %v929_v1 = vpop.eup %928 }
 0x4a7   : >> { %v618_v8 = vadd.f32 1.0, %v929_v1 }
 0x4a8   : >> { %v587_v1 = vpop.permute.xlu1 %586 }
 0x4a9   : >> { %930 = vrcp.f32 %v618_v8  ;;  %v630_v58 = vand.u32 2147483648, %v618_v8  ;;  %v628_v59 = vand.u32 2147483647, %v618_v8  ;;  %vm624_vm14 = vweird.f32 %v618_v8 }
 0x4ab   : >> { %v631_v53 = vor.u32 1.1754944e-38, %v630_v58  ;;  %vm629_vm0 = vcmp.eq.f32.partialorder %v628_v59, 8.507059e+37 }
 0x4af   : >> { %v931_v9 = vpop.eup %930 }
 0x4b0   : >> { %v620_v63 = vmul.f32 %v931_v9, %v618_v8  ;;  %vm625_vm13 = vweird.f32 %v931_v9  ;;  %v589_v8 = vadd.f32 %v587_v1, %v581_v4 }
 0x4b1   : >> { %vm626_vm15 = vmor %vm624_vm14, %vm625_vm13 }
 0x4b2   : >> { %v621_v57 = vsub.f32 1.0, %v620_v63 }
 0x4b4   : >> { %v622_v54 = vmul.f32 %v931_v9, %v621_v57 }
 0x4b6   : >> { %v623_v60 = vadd.f32 %v931_v9, %v622_v54 }
 0x4b8   : >> { %v627_v61 = vsel %vm626_vm15, %v931_v9, %v623_v60 }
 0x4b9   : >> { %v632_v55 = vsel %vm629_vm0, %v631_v53, %v627_v61 }
 0x4ba   : >> { %v643_v2 = vmul.f32 %v641_v62, %v632_v55  ;;  %v650_v9 = vsub.f32 1.0, %v632_v55  ;;  %v659_v57 = vmul.f32 %v657_v7, %v632_v55 }
 0x4bc   : >> { %645 = vrot.lane.b32.xlu2 %v643_v2, %s1046_s16 }
 0x516   : >> { %v646_v3 = vpop.permute.xlu2 %645 }
 0x517   : >> { %v648_v56 = vadd.f32 %v646_v3, %v584_v5 }
 0x519   : >> { %932 = vtanh.f32 %v648_v56 }
 0x51f   : >> { %v933_v6 = vpop.eup %932 }
 0x520   : >> { %652 = vrot.lane.b32.xlu0 %v933_v6, %s1050_s21 }
 0x528   : >> { %477 = vrot.lane.b32.xlu0 %v1223_v48, %s1047_s17 }
 0x530   : >> { %687 = vrot.lane.b32.xlu0 %v589_v8, %s1051_s23 }
 0x592   : >> { %v653_v63 = vpop.permute.xlu0 %652 }
 0x593   : >> { %v655_v58 = vmul.f32 %v653_v63, %v650_v9 }
 0x595   : >> { %v660_v54 = vadd.f32 %v659_v57, %v655_v58 }
 0x597   : >> { %662 = vrot.lane.b32.xlu2 %v660_v54, %s1050_s21 }
 0x59a   : >> { %v478_v5 = vpop.permute.xlu0 %477 }
 0x59b   : >> { %v480_v59 = vadd.f32 %v478_v5, %v1330_v0 }
 0x59f   : >> { %482 = vrot.lane.b32.xlu2 %v480_v59, %s1046_s16 }
 0x5a2   : >> { %v688_v60 = vpop.permute.xlu0 %687  }
 0x5a3   : >> { %v1397_v1 = vmov %v688_v60  ;;  %692 = vst.msk [vmem:[#allocation5] sm:$0x3] (%p312_p8), %vm691_vm2, %v688_v60 }
 0x5f1   : >> { %v663_v61 = vpop.permute.xlu2 %662  }
 0x5f2   : >> { %841 = vmatmul.msk.f32.vlgmr.msrb.gmra.mxu3 %vm590_vm12, %v663_v61  ;;  %v1395_v54 = vmov %v663_v61 }
 0x5f9   : >> { %v483_v4 = vpop.permute.xlu2 %482 }
 0x5fa   : >> { %487 = vst.msk [vmem:[%s485_s24] sm:$0x3] %vm486_vm1, %v483_v4 }
 0x674   : > { %314 = sbr.rel (!%p312_p8) target bundleno = 152 (0x98), region = 93 }
 0x675   : >> { %v683_v53 = vpop.f32.mrf.mxu3 }
 0x676   : >> { %v684_v62 = vadd.f32 %v683_v53, %v1243_v52  }
 0x678   : >> { %v1396_v53 = vmov %v684_v62  ;;  %694 = vrot.lane.b32.xlu0 (%p312_p8), %v684_v62, %s1043_s12 }
 0x680   : > { %700 = vrot.lane.b32.xlu0 %v663_v61, %s1052_s25 }
 0x6ea   : > { %v695_v0 = vpop.permute.xlu0 %694 }
 0x6eb   : > { %698 = vst.msk [vmem:[#allocation5] sm:$0x3] %vm697_vm3, %v695_v0 }
 0x6f2   : > { %v701_v10 = vpop.permute.xlu0 %700 }
 0x6f3   : > { %704 = vst.msk [vmem:[#allocation5] sm:$0x3] %vm703_vm4, %v701_v10 }
 0x6f4   : > { %851 = dma.vmem_to_hbm [thread:$0]  (%p860_p9), %s721_s27, 32, %s723_s30, [#allocation4]  }
 0x6f5   : > { %1017 = dma.done.wait (%p860_p9), [#allocation4], 32  }
 0x6f6   : > { %1019 = vsyncadd (%p860_p9), [#allocation4], 4294967264 }
 0x6f7 PF: > { %s18_s18 = sadd.s32 1, %s1022_s18  }
 0x6f8   : > { %p15_p10 = scmp.ge.s32.totalorder %s18_s18, 5  }
 0x6fa   :  { %17 = sbr.rel (!%p15_p10) target bundleno = 2 (0x2), region = 104 }
 0x6ff   :  { %744 = vsyncpa [#allocation3], 1 }
 0x700   :  { %746 = vsyncpa [#allocation3 + $0x1], 1 }
 0x701   :  { %747 = vsyncpa [#allocation4], 1 }
 0x702   :  { %749 = vsyncpa [#allocation4 + $0x1], 1 }

</bundles_post_ra>
